<compile_context>
chip_gen: v6e
topology: v6e:2x2x1
jax: 0.10.0
libtpu: 0.0.40
codegen_flags: <defaults>
</compile_context>

<pallas_src>
import math
from functools import partial

import jax
import jax.numpy as jnp
from jax import lax
from jax.experimental import pallas as pl
from jax.experimental.pallas import tpu as pltpu


def _attention_kernel(x_ref, wqkv_ref, bqkv_ref, wproj_ref, bproj_ref, o_ref,
                      *, num_heads, head_dim, scale):
    """Fused multi-head self-attention for one batch element.

    x_ref     : (1, N, C)  activations for this grid step's batch element
    wqkv_ref  : (C, 3C)    qkv weight (pre-transposed so we compute x @ W)
    bqkv_ref  : (1, 3C)    qkv bias (zeros when qkv_bias=False)
    wproj_ref : (C, C)     output-projection weight (pre-transposed)
    bproj_ref : (1, C)     output-projection bias
    o_ref     : (1, N, C)  output block
    """
    C = num_heads * head_dim
    x = x_ref[0]                                               # (N, C)

    # QKV projection on the MXU, f32 accumulation.
    qkv = jnp.dot(x, wqkv_ref[...], preferred_element_type=jnp.float32)
    qkv = qkv + bqkv_ref[...]                                  # (N, 3C)

    n = x.shape[0]
    acc = jnp.zeros((n, C), dtype=jnp.float32)
    for h in range(num_heads):                                 # static unroll
        lo = h * head_dim
        q = qkv[:, lo:lo + head_dim] * scale                   # (N, hd)
        k = qkv[:, C + lo:C + lo + head_dim]                   # (N, hd)
        v = qkv[:, 2 * C + lo:2 * C + lo + head_dim]           # (N, hd)

        # scores = q @ k^T  (NT matmul: contract last dim of both operands)
        s = lax.dot_general(q, k, (((1,), (1,)), ((), ())),
                            preferred_element_type=jnp.float32)  # (N, N)

        # Numerically stable softmax over the key dimension.
        s = s - jnp.max(s, axis=-1, keepdims=True)
        p = jnp.exp(s)
        p = p / jnp.sum(p, axis=-1, keepdims=True)

        o_h = jnp.dot(p, v, preferred_element_type=jnp.float32)  # (N, hd)

        # Fold the output projection in per head:
        #   concat_h(o_h) @ W_proj == sum_h o_h @ W_proj[h*hd:(h+1)*hd, :]
        w_h = wproj_ref[lo:lo + head_dim, :]                      # (hd, C)
        acc = acc + jnp.dot(o_h, w_h, preferred_element_type=jnp.float32)

    out = acc + bproj_ref[...]                                    # f32 epilogue
    o_ref[0] = out.astype(o_ref.dtype)


def attention(x, qkv_weight, proj_weight, proj_bias, *, num_heads,
              qkv_bias=None):
    """x: (B, N, C). qkv_weight: (3C, C), proj_weight: (C, C), proj_bias: (C,)
    in PyTorch nn.Linear (out, in) layout. qkv_bias: (3C,) or None.
    Returns (B, N, C), matching Attention.forward."""
    B, N, C = x.shape
    assert C % num_heads == 0, "dim should be divisible by num heads"
    head_dim = C // num_heads
    scale = head_dim ** -0.5

    # nn.Linear computes x @ W.T; pre-transpose once in the wrapper.
    w_qkv = qkv_weight.T                                       # (C, 3C)
    w_proj = proj_weight.T                                     # (C, C)
    b_qkv = (jnp.zeros((3 * C,), x.dtype) if qkv_bias is None else qkv_bias)
    b_qkv = b_qkv.reshape(1, 3 * C)
    b_proj = proj_bias.reshape(1, C)

    kernel = partial(_attention_kernel, num_heads=num_heads,
                     head_dim=head_dim, scale=scale)

    return pl.pallas_call(
        kernel,
        out_shape=jax.ShapeDtypeStruct((B, N, C), x.dtype),
        grid=(B,),
        in_specs=[
            pl.BlockSpec((1, N, C), lambda b: (b, 0, 0)),
            # Constant block indices: weights/biases loaded once, stay resident.
            pl.BlockSpec((C, 3 * C), lambda b: (0, 0)),
            pl.BlockSpec((1, 3 * C), lambda b: (0, 0)),
            pl.BlockSpec((C, C), lambda b: (0, 0)),
            pl.BlockSpec((1, C), lambda b: (0, 0)),
        ],
        out_specs=pl.BlockSpec((1, N, C), lambda b: (b, 0, 0)),
        compiler_params=pltpu.CompilerParams(
            dimension_semantics=("parallel",)),
    )(x, w_qkv, b_qkv, w_proj, b_proj)


if __name__ == "__main__":
    # Small shapes implied by the module: batch=2, seq=8, dim=32, heads=4.
    B, N, C, H = 2, 8, 32, 4
    hd = C // H
    key = jax.random.PRNGKey(0)
    kx, kw1, kw2, kb2 = jax.random.split(key, 4)

    x = jax.random.normal(kx, (B, N, C), dtype=jnp.float32)

    # Deterministic parameters in the PyTorch nn.Linear (out, in) layout.
    bound = 1.0 / math.sqrt(C)
    qkv_weight = jax.random.uniform(kw1, (3 * C, C), jnp.float32, -bound, bound)
    proj_weight = jax.random.uniform(kw2, (C, C), jnp.float32, -bound, bound)
    proj_bias = jax.random.uniform(kb2, (C,), jnp.float32, -bound, bound)

    out = attention(x, qkv_weight, proj_weight, proj_bias, num_heads=H)
    jax.block_until_ready(out)

    # Pure-JAX reference of the same forward pass (qkv_bias=False, qk_norm off,
    # dropout p=0 -> identity), mirroring the PyTorch module exactly.
    qkv = (x @ qkv_weight.T).reshape(B, N, 3, H, hd).transpose(2, 0, 3, 1, 4)
    q, k, v = qkv[0], qkv[1], qkv[2]                  # (B, H, N, hd)
    q = q * (hd ** -0.5)
    attn = jax.nn.softmax(jnp.einsum("bhqd,bhkd->bhqk", q, k), axis=-1)
    ref = jnp.einsum("bhqk,bhkd->bhqd", attn, v)
    ref = ref.transpose(0, 2, 1, 3).reshape(B, N, C)
    ref = ref @ proj_weight.T + proj_bias

    assert out.shape == (B, N, C)
    assert jnp.allclose(out, ref, atol=1e-5, rtol=1e-5), float(
        jnp.max(jnp.abs(out - ref)))
    print("KERNEL_OK")
</pallas_src>

<mosaic_0001>
module attributes {stable_mosaic.version = 11 : i64} {
  func.func @_attention_kernel(%arg0: i32, %arg1: memref<1x8x32xf32, #tpu.memory_space<vmem>>, %arg2: memref<32x96xf32, #tpu.memory_space<vmem>>, %arg3: memref<1x96xf32, #tpu.memory_space<vmem>>, %arg4: memref<32x32xf32, #tpu.memory_space<vmem>>, %arg5: memref<1x32xf32, #tpu.memory_space<vmem>>, %arg6: memref<1x8x32xf32, #tpu.memory_space<vmem>>) attributes {dimension_semantics = [#tpu.dimension_semantics<parallel>], iteration_bounds = array<i64: 2>, scalar_prefetch = 0 : i64, scratch_operands = 0 : i64, tpu.core_type = #tpu.core_type<tc>, window_params = [{transform_indices = @transform_0, window_bounds = array<i64: 1, 8, 32>}, {pipeline_mode = #tpu.pipeline_mode<synchronous>, transform_indices = @transform_1, window_bounds = array<i64: 32, 96>}, {pipeline_mode = #tpu.pipeline_mode<synchronous>, transform_indices = @transform_2, window_bounds = array<i64: 1, 96>}, {pipeline_mode = #tpu.pipeline_mode<synchronous>, transform_indices = @transform_3, window_bounds = array<i64: 32, 32>}, {pipeline_mode = #tpu.pipeline_mode<synchronous>, transform_indices = @transform_4, window_bounds = array<i64: 1, 32>}, {transform_indices = @transform_5, window_bounds = array<i64: 1, 8, 32>}]} {
    %c0 = arith.constant 0 : index
    %c0_0 = arith.constant 0 : index
    %c0_1 = arith.constant 0 : index
    %0 = vector.load %arg1[%c0, %c0_0, %c0_1] : memref<1x8x32xf32, #tpu.memory_space<vmem>>, vector<1x8x32xf32>
    %1 = vector.shape_cast %0 : vector<1x8x32xf32> to vector<8x32xf32>
    %c0_2 = arith.constant 0 : index
    %c0_3 = arith.constant 0 : index
    %2 = vector.load %arg2[%c0_2, %c0_3] : memref<32x96xf32, #tpu.memory_space<vmem>>, vector<32x96xf32>
    %cst = arith.constant dense<0.000000e+00> : vector<8x96xf32>
    %3 = tpu.matmul %1, %2, %cst {dimension_numbers = #tpu.dot_dimension_numbers<[1], [0], [0], [1], [0, 0, 1, 1], [], []>} : vector<8x32xf32>, vector<32x96xf32>, vector<8x96xf32> -> vector<8x96xf32>
    %c0_4 = arith.constant 0 : index
    %c0_5 = arith.constant 0 : index
    %4 = vector.load %arg3[%c0_4, %c0_5] : memref<1x96xf32, #tpu.memory_space<vmem>>, vector<1x96xf32>
    %5 = vector.broadcast %4 : vector<1x96xf32> to vector<8x96xf32>
    %6 = arith.addf %3, %5 : vector<8x96xf32>
    %cst_6 = arith.constant 0.000000e+00 : f32
    %7 = vector.broadcast %cst_6 : f32 to vector<8x32xf32>
    %8 = vector.extract_strided_slice %6 {offsets = [0, 0], sizes = [8, 8], strides = [1, 1]} : vector<8x96xf32> to vector<8x8xf32>
    %cst_7 = arith.constant 0.353553385 : f32
    %9 = vector.broadcast %cst_7 : f32 to vector<8x8xf32>
    %10 = arith.mulf %8, %9 : vector<8x8xf32>
    %11 = vector.extract_strided_slice %6 {offsets = [0, 32], sizes = [8, 8], strides = [1, 1]} : vector<8x96xf32> to vector<8x8xf32>
    %12 = vector.extract_strided_slice %6 {offsets = [0, 64], sizes = [8, 8], strides = [1, 1]} : vector<8x96xf32> to vector<8x8xf32>
    %cst_8 = arith.constant dense<0.000000e+00> : vector<8x8xf32>
    %13 = tpu.matmul %10, %11, %cst_8 {dimension_numbers = #tpu.dot_dimension_numbers<[1], [1], [0], [0], [0, 0, 1, 0], [], []>} : vector<8x8xf32>, vector<8x8xf32>, vector<8x8xf32> -> vector<8x8xf32>
    %cst_9 = arith.constant dense<0xFF800000> : vector<8xf32>
    %14 = vector.multi_reduction <maximumf>, %13, %cst_9 [1] : vector<8x8xf32> to vector<8xf32>
    %15 = vector.shape_cast %14 : vector<8xf32> to vector<8x1xf32>
    %16 = vector.broadcast %15 : vector<8x1xf32> to vector<8x8xf32>
    %17 = arith.subf %13, %16 : vector<8x8xf32>
    %18 = math.exp %17 : vector<8x8xf32>
    %cst_10 = arith.constant dense<0.000000e+00> : vector<8xf32>
    %19 = vector.multi_reduction <add>, %18, %cst_10 [1] : vector<8x8xf32> to vector<8xf32>
    %20 = vector.shape_cast %19 : vector<8xf32> to vector<8x1xf32>
    %21 = vector.broadcast %20 : vector<8x1xf32> to vector<8x8xf32>
    %22 = arith.divf %18, %21 : vector<8x8xf32>
    %cst_11 = arith.constant dense<0.000000e+00> : vector<8x8xf32>
    %23 = tpu.matmul %22, %12, %cst_11 {dimension_numbers = #tpu.dot_dimension_numbers<[1], [0], [0], [1], [0, 0, 1, 1], [], []>} : vector<8x8xf32>, vector<8x8xf32>, vector<8x8xf32> -> vector<8x8xf32>
    %c0_12 = arith.constant 0 : index
    %c0_13 = arith.constant 0 : index
    %24 = vector.load %arg4[%c0_12, %c0_13] : memref<32x32xf32, #tpu.memory_space<vmem>>, vector<8x32xf32>
    %cst_14 = arith.constant dense<0.000000e+00> : vector<8x32xf32>
    %25 = tpu.matmul %23, %24, %cst_14 {dimension_numbers = #tpu.dot_dimension_numbers<[1], [0], [0], [1], [0, 0, 1, 1], [], []>} : vector<8x8xf32>, vector<8x32xf32>, vector<8x32xf32> -> vector<8x32xf32>
    %26 = arith.addf %7, %25 : vector<8x32xf32>
    %27 = vector.extract_strided_slice %6 {offsets = [0, 8], sizes = [8, 8], strides = [1, 1]} : vector<8x96xf32> to vector<8x8xf32>
    %cst_15 = arith.constant 0.353553385 : f32
    %28 = vector.broadcast %cst_15 : f32 to vector<8x8xf32>
    %29 = arith.mulf %27, %28 : vector<8x8xf32>
    %30 = vector.extract_strided_slice %6 {offsets = [0, 40], sizes = [8, 8], strides = [1, 1]} : vector<8x96xf32> to vector<8x8xf32>
    %31 = vector.extract_strided_slice %6 {offsets = [0, 72], sizes = [8, 8], strides = [1, 1]} : vector<8x96xf32> to vector<8x8xf32>
    %cst_16 = arith.constant dense<0.000000e+00> : vector<8x8xf32>
    %32 = tpu.matmul %29, %30, %cst_16 {dimension_numbers = #tpu.dot_dimension_numbers<[1], [1], [0], [0], [0, 0, 1, 0], [], []>} : vector<8x8xf32>, vector<8x8xf32>, vector<8x8xf32> -> vector<8x8xf32>
    %cst_17 = arith.constant dense<0xFF800000> : vector<8xf32>
    %33 = vector.multi_reduction <maximumf>, %32, %cst_17 [1] : vector<8x8xf32> to vector<8xf32>
    %34 = vector.shape_cast %33 : vector<8xf32> to vector<8x1xf32>
    %35 = vector.broadcast %34 : vector<8x1xf32> to vector<8x8xf32>
    %36 = arith.subf %32, %35 : vector<8x8xf32>
    %37 = math.exp %36 : vector<8x8xf32>
    %cst_18 = arith.constant dense<0.000000e+00> : vector<8xf32>
    %38 = vector.multi_reduction <add>, %37, %cst_18 [1] : vector<8x8xf32> to vector<8xf32>
    %39 = vector.shape_cast %38 : vector<8xf32> to vector<8x1xf32>
    %40 = vector.broadcast %39 : vector<8x1xf32> to vector<8x8xf32>
    %41 = arith.divf %37, %40 : vector<8x8xf32>
    %cst_19 = arith.constant dense<0.000000e+00> : vector<8x8xf32>
    %42 = tpu.matmul %41, %31, %cst_19 {dimension_numbers = #tpu.dot_dimension_numbers<[1], [0], [0], [1], [0, 0, 1, 1], [], []>} : vector<8x8xf32>, vector<8x8xf32>, vector<8x8xf32> -> vector<8x8xf32>
    %c8 = arith.constant 8 : index
    %c0_20 = arith.constant 0 : index
    %43 = vector.load %arg4[%c8, %c0_20] : memref<32x32xf32, #tpu.memory_space<vmem>>, vector<8x32xf32>
    %cst_21 = arith.constant dense<0.000000e+00> : vector<8x32xf32>
    %44 = tpu.matmul %42, %43, %cst_21 {dimension_numbers = #tpu.dot_dimension_numbers<[1], [0], [0], [1], [0, 0, 1, 1], [], []>} : vector<8x8xf32>, vector<8x32xf32>, vector<8x32xf32> -> vector<8x32xf32>
    %45 = arith.addf %26, %44 : vector<8x32xf32>
    %46 = vector.extract_strided_slice %6 {offsets = [0, 16], sizes = [8, 8], strides = [1, 1]} : vector<8x96xf32> to vector<8x8xf32>
    %cst_22 = arith.constant 0.353553385 : f32
    %47 = vector.broadcast %cst_22 : f32 to vector<8x8xf32>
    %48 = arith.mulf %46, %47 : vector<8x8xf32>
    %49 = vector.extract_strided_slice %6 {offsets = [0, 48], sizes = [8, 8], strides = [1, 1]} : vector<8x96xf32> to vector<8x8xf32>
    %50 = vector.extract_strided_slice %6 {offsets = [0, 80], sizes = [8, 8], strides = [1, 1]} : vector<8x96xf32> to vector<8x8xf32>
    %cst_23 = arith.constant dense<0.000000e+00> : vector<8x8xf32>
    %51 = tpu.matmul %48, %49, %cst_23 {dimension_numbers = #tpu.dot_dimension_numbers<[1], [1], [0], [0], [0, 0, 1, 0], [], []>} : vector<8x8xf32>, vector<8x8xf32>, vector<8x8xf32> -> vector<8x8xf32>
    %cst_24 = arith.constant dense<0xFF800000> : vector<8xf32>
    %52 = vector.multi_reduction <maximumf>, %51, %cst_24 [1] : vector<8x8xf32> to vector<8xf32>
    %53 = vector.shape_cast %52 : vector<8xf32> to vector<8x1xf32>
    %54 = vector.broadcast %53 : vector<8x1xf32> to vector<8x8xf32>
    %55 = arith.subf %51, %54 : vector<8x8xf32>
    %56 = math.exp %55 : vector<8x8xf32>
    %cst_25 = arith.constant dense<0.000000e+00> : vector<8xf32>
    %57 = vector.multi_reduction <add>, %56, %cst_25 [1] : vector<8x8xf32> to vector<8xf32>
    %58 = vector.shape_cast %57 : vector<8xf32> to vector<8x1xf32>
    %59 = vector.broadcast %58 : vector<8x1xf32> to vector<8x8xf32>
    %60 = arith.divf %56, %59 : vector<8x8xf32>
    %cst_26 = arith.constant dense<0.000000e+00> : vector<8x8xf32>
    %61 = tpu.matmul %60, %50, %cst_26 {dimension_numbers = #tpu.dot_dimension_numbers<[1], [0], [0], [1], [0, 0, 1, 1], [], []>} : vector<8x8xf32>, vector<8x8xf32>, vector<8x8xf32> -> vector<8x8xf32>
    %c16 = arith.constant 16 : index
    %c0_27 = arith.constant 0 : index
    %62 = vector.load %arg4[%c16, %c0_27] : memref<32x32xf32, #tpu.memory_space<vmem>>, vector<8x32xf32>
    %cst_28 = arith.constant dense<0.000000e+00> : vector<8x32xf32>
    %63 = tpu.matmul %61, %62, %cst_28 {dimension_numbers = #tpu.dot_dimension_numbers<[1], [0], [0], [1], [0, 0, 1, 1], [], []>} : vector<8x8xf32>, vector<8x32xf32>, vector<8x32xf32> -> vector<8x32xf32>
    %64 = arith.addf %45, %63 : vector<8x32xf32>
    %65 = vector.extract_strided_slice %6 {offsets = [0, 24], sizes = [8, 8], strides = [1, 1]} : vector<8x96xf32> to vector<8x8xf32>
    %cst_29 = arith.constant 0.353553385 : f32
    %66 = vector.broadcast %cst_29 : f32 to vector<8x8xf32>
    %67 = arith.mulf %65, %66 : vector<8x8xf32>
    %68 = vector.extract_strided_slice %6 {offsets = [0, 56], sizes = [8, 8], strides = [1, 1]} : vector<8x96xf32> to vector<8x8xf32>
    %69 = vector.extract_strided_slice %6 {offsets = [0, 88], sizes = [8, 8], strides = [1, 1]} : vector<8x96xf32> to vector<8x8xf32>
    %cst_30 = arith.constant dense<0.000000e+00> : vector<8x8xf32>
    %70 = tpu.matmul %67, %68, %cst_30 {dimension_numbers = #tpu.dot_dimension_numbers<[1], [1], [0], [0], [0, 0, 1, 0], [], []>} : vector<8x8xf32>, vector<8x8xf32>, vector<8x8xf32> -> vector<8x8xf32>
    %cst_31 = arith.constant dense<0xFF800000> : vector<8xf32>
    %71 = vector.multi_reduction <maximumf>, %70, %cst_31 [1] : vector<8x8xf32> to vector<8xf32>
    %72 = vector.shape_cast %71 : vector<8xf32> to vector<8x1xf32>
    %73 = vector.broadcast %72 : vector<8x1xf32> to vector<8x8xf32>
    %74 = arith.subf %70, %73 : vector<8x8xf32>
    %75 = math.exp %74 : vector<8x8xf32>
    %cst_32 = arith.constant dense<0.000000e+00> : vector<8xf32>
    %76 = vector.multi_reduction <add>, %75, %cst_32 [1] : vector<8x8xf32> to vector<8xf32>
    %77 = vector.shape_cast %76 : vector<8xf32> to vector<8x1xf32>
    %78 = vector.broadcast %77 : vector<8x1xf32> to vector<8x8xf32>
    %79 = arith.divf %75, %78 : vector<8x8xf32>
    %cst_33 = arith.constant dense<0.000000e+00> : vector<8x8xf32>
    %80 = tpu.matmul %79, %69, %cst_33 {dimension_numbers = #tpu.dot_dimension_numbers<[1], [0], [0], [1], [0, 0, 1, 1], [], []>} : vector<8x8xf32>, vector<8x8xf32>, vector<8x8xf32> -> vector<8x8xf32>
    %c24 = arith.constant 24 : index
    %c0_34 = arith.constant 0 : index
    %81 = vector.load %arg4[%c24, %c0_34] : memref<32x32xf32, #tpu.memory_space<vmem>>, vector<8x32xf32>
    %cst_35 = arith.constant dense<0.000000e+00> : vector<8x32xf32>
    %82 = tpu.matmul %80, %81, %cst_35 {dimension_numbers = #tpu.dot_dimension_numbers<[1], [0], [0], [1], [0, 0, 1, 1], [], []>} : vector<8x8xf32>, vector<8x32xf32>, vector<8x32xf32> -> vector<8x32xf32>
    %83 = arith.addf %64, %82 : vector<8x32xf32>
    %c0_36 = arith.constant 0 : index
    %c0_37 = arith.constant 0 : index
    %84 = vector.load %arg5[%c0_36, %c0_37] : memref<1x32xf32, #tpu.memory_space<vmem>>, vector<1x32xf32>
    %85 = vector.broadcast %84 : vector<1x32xf32> to vector<8x32xf32>
    %86 = arith.addf %83, %85 : vector<8x32xf32>
    %c0_38 = arith.constant 0 : index
    %c0_39 = arith.constant 0 : index
    %c0_40 = arith.constant 0 : index
    %87 = vector.load %arg6[%c0_38, %c0_39, %c0_40] : memref<1x8x32xf32, #tpu.memory_space<vmem>>, vector<1x8x32xf32>
    %88 = vector.shape_cast %87 : vector<1x8x32xf32> to vector<8x32xf32>
    %89 = vector.shape_cast %86 : vector<8x32xf32> to vector<1x8x32xf32>
    tpu.vector_store %arg6[%c0_38, %c0_39, %c0_40], %89 {strides = array<i32>} : memref<1x8x32xf32, #tpu.memory_space<vmem>>, vector<1x8x32xf32>,
    return
  }
  func.func @transform_0(%arg0: i32) -> (i32, i32, i32) {
    %c0_i32 = arith.constant 0 : i32
    %c0_i32_0 = arith.constant 0 : i32
    %c0_i32_1 = arith.constant 0 : i32
    return %arg0, %c0_i32, %c0_i32_0 : i32, i32, i32
  }
  func.func @transform_1(%arg0: i32) -> (i32, i32) {
    %c0_i32 = arith.constant 0 : i32
    %c0_i32_0 = arith.constant 0 : i32
    %c0_i32_1 = arith.constant 0 : i32
    return %c0_i32, %c0_i32_0 : i32, i32
  }
  func.func @transform_2(%arg0: i32) -> (i32, i32) {
    %c0_i32 = arith.constant 0 : i32
    %c0_i32_0 = arith.constant 0 : i32
    %c0_i32_1 = arith.constant 0 : i32
    return %c0_i32, %c0_i32_0 : i32, i32
  }
  func.func @transform_3(%arg0: i32) -> (i32, i32) {
    %c0_i32 = arith.constant 0 : i32
    %c0_i32_0 = arith.constant 0 : i32
    %c0_i32_1 = arith.constant 0 : i32
    return %c0_i32, %c0_i32_0 : i32, i32
  }
  func.func @transform_4(%arg0: i32) -> (i32, i32) {
    %c0_i32 = arith.constant 0 : i32
    %c0_i32_0 = arith.constant 0 : i32
    %c0_i32_1 = arith.constant 0 : i32
    return %c0_i32, %c0_i32_0 : i32, i32
  }
  func.func @transform_5(%arg0: i32) -> (i32, i32, i32) {
    %c0_i32 = arith.constant 0 : i32
    %c0_i32_0 = arith.constant 0 : i32
    %c0_i32_1 = arith.constant 0 : i32
    return %arg0, %c0_i32, %c0_i32_0 : i32, i32, i32
  }
}

</mosaic_0001>

<bundles_post_ra>
// kernel: tpu_custom_call.1
= control target key start
LH: loop header
LB: loop body
LE: loop exit
PB: predicated region body
PF: predicated region fallthrough
CT: control target
= control target key end

     0   :  { %10 = vsyncpa [#allocation3], 0  ;;  %s2119_s0 = inlined_call_operand.hbm [shape: f32[2,8,32], index: 0, kind: input, shape index: {}]   ;;  %s2120_s1 = inlined_call_operand.hbm [shape: f32[32,96], index: 1, kind: input, shape index: {}]   ;;  %s2121_s2 = inlined_call_operand.vmem [shape: f32[1,96], index: 2, kind: input, shape index: {}]   ;;  %s2122_s3 = inlined_call_operand.hbm [shape: f32[32,32], index: 3, kind: input, shape index: {}]   ;;  %s2123_s4 = inlined_call_operand.vmem [shape: f32[1,32], index: 4, kind: input, shape index: {}]   ;;  %s2124_s5 = inlined_call_operand.hbm [shape: f32[2,8,32], index: 5, kind: output, shape index: {}]  }
   0x1   :  { %12 = vsyncpa [#allocation3 + $0x1], 0 }
   0x2   :  { %13 = vsyncpa [#allocation6], 0 }
   0x3   :  { %14 = vsyncpa [#allocation4], 0 }
   0x4   :  { %16 = vsyncpa [#allocation4 + $0x1], 0  ;;  %s1859_s18 = smov 0   ;;  %s1861_s19 = smov 0  }
   0x5   :  { %s1863_s20 = smov 0   ;;  %s1865_s21 = smov 0  }
   0x6 LB: > { %s1880_s22 = sadd.s32 4294967295, %s1808_s21   ;;  %s1427_s23 = sadd.s32 4294967294, %s1808_s21   ;;  %s1808_s21 = sphi %s1865_s21, %s2146_s21   ;;  %s1804_s20 = sphi %s1863_s20, %s2145_s20   ;;  %s1800_s19 = sphi %s1861_s19, %s2144_s19   ;;  %s1796_s18 = sphi %s1859_s18, %s2143_s18  }
   0x7   : > { %p42_p0 = scmp.ne.s32.totalorder %s1800_s19, %s1796_s18  ;;  %p2125_p1 = scmp.eq.s32.totalorder %s1880_s22, 0 }
   0x8   : > { %p156_p3 = scmp.eq.s32.totalorder %s1427_s23, 1  ;;  %p1428_p5 = scmp.ge.s32.totalorder %s1808_s21, 1 }
   0x9   : > { %p1889_p4 = por %p2125_p1, %p42_p0  ;;  %p163_p7 = scmp.lt.s32.totalorder %s1808_s21, 3 }
   0xa   : > { %p1894_p6 = por %p156_p3, %p42_p0  ;;  %s1810_s27 = smov [#allocation5]  }
   0xb   : > { %s2129_s24 = scalar_select %p1889_p4, 1, 0 }
   0xc   : > { %s2130_s25 = scalar_select %p1894_p6, 1, 0 }
   0xd   : > { %p1899_p8 = pnand %p1428_p5, %p163_p7  ;;  %s175_s28 = sshll.u32 %s1810_s27, 4  ;;  %s176_s28 = int_to_ptr.vmem [resolvable:$true] %s175_s28 }
   0xe   : > { %s1811_s30 = smov [#allocation7]   ;;  %s1671_s7 = scalar_lea.vmem %s176_s28, 512 }
   0xf   : > { %s2131_s26 = scalar_select %p1899_p8, 1, 0 }
  0x10   : > { %p1574_p9 = pneg %p1899_p8  ;;  %s191_s6 = sshll.u32 %s1811_s30, 4  ;;  %s192_s6 = int_to_ptr.vmem [resolvable:$true] %s191_s6 }
  0x11   : > { %p1672_p13 = scmp.ne.s32.totalorder %s176_s28, %s1671_s7  ;;  %p1679_p5 = scmp.lt.s32.totalorder %s176_s28, %s176_s28 }
  0x12   : > { %p1908_p11 = pnand %p1574_p9, %p2125_p1  ;;  %p1680_p7 = scmp.lt.s32.totalorder %s1671_s7, %s1671_s7 }
  0x14   : > { %p1662_p12 = pneg %p1908_p11  ;;  %p1681_p10 = por %p1680_p7, %p1679_p5 }
  0x16   : > { %p1674_p0 = pnand %p1672_p13, %p1662_p12 }
  0x18   : > { %p1675_p3 = pneg %p1674_p0 }
  0x1a   : > { %p1682_p9 = pnand %p1681_p10, %p1675_p3 }
  0x1c   : > { %1685 = shalt.err (!%p1682_p9)
}
  0x1d   : > { %s1812_s8 = smov 128   ;;  %s1813_s9 = smov 8  }
  0x1e   : > { %1577 = dma.hbm_to_vmem [thread:$0]  (!%p1908_p11), %s2120_s1, 512, %s176_s28, [#allocation6], %s1812_s8, %s1812_s8, %s1813_s9  }
  0x1f   : > { %s1697_s12 = scalar_lea.vmem %s192_s6, 512  ;;  %p1705_p2 = scmp.lt.s32.totalorder %s192_s6, %s192_s6 }
  0x20   : > { %p1698_p1 = scmp.ne.s32.totalorder %s192_s6, %s1697_s12  ;;  %p1706_p6 = scmp.lt.s32.totalorder %s1697_s12, %s1697_s12 }
  0x22   : > { %p1700_p13 = pnand %p1698_p1, %p1662_p12  ;;  %p1707_p5 = por %p1706_p6, %p1705_p2 }
  0x24   : > { %p1701_p0 = pneg %p1700_p13 }
  0x26   : > { %p1708_p10 = pnand %p1707_p5, %p1701_p0 }
  0x28   : > { %1711 = shalt.err (!%p1708_p10)
}
  0x29   : > { %1580 = dma.hbm_to_vmem [thread:$0]  (!%p1908_p11), %s2122_s3, 512, %s192_s6, [#allocation6], %s1812_s8, %s1812_s8, %s1813_s9  }
  0x2a   : > { %s1931_s15 = sadd.s32 1, %s1808_s21   ;;  %s29_s16 = sadd.s32 1, %s1804_s20 }
  0x2b   : > { %s26_s17 = ssub.s32 %s1808_s21, %s1931_s15  ;;  %p36_p1 = scmp.ne.s32.totalorder %s1804_s20, %s1800_s19 }
  0x2c   : > { %p27_p2 = scmp.eq.s32.totalorder %s26_s17, 0  ;;  %p37_p6 = scmp.eq.s32.totalorder %s1808_s21, 0 }
  0x2d   : > { %p2133_p12 = scmp.eq.s32.totalorder %s1880_s22, 1  ;;  %p1591_p7 = scmp.lt.s32.totalorder %s1808_s21, 2 }
  0x2e   : > { %s1947_s27 = scalar_select %p27_p2, %s1804_s20, %s29_s16  }
  0x2f   : > { %p1941_p3 = por %p2133_p12, %p36_p1  ;;  %p38_p9 = por %p37_p6, %p36_p1 }
  0x30   : > { %s208_s28 = sand.u32 1, %s1804_s20   ;;  %s1433_s30 = sshll.u32 %s1808_s21, 7 }
  0x31   : > { %s2134_s23 = scalar_select %p1941_p3, 1, 0 }
  0x32   : > { %s1432_s29 = sshll.u32 %s208_s28, 3  ;;  %s1954_s8 = scalar_lea.hbm %s2119_s0, %s1433_s30 }
  0x33   : > { %s212_s9 = scalar_lea.vmem [#allocation2], %s1432_s29  ;;  %p1956_p11 = pnand %p1591_p7, %p38_p9 }
  0x34   : > { %s219_s10 = sshll.u32 %s212_s9, 4  ;;  %s209_s12 = scalar_lea.sflag [#allocation3], %s208_s28  ;;  %s220_s10 = int_to_ptr.vmem [resolvable:$true] %s219_s10 }
  0x35   : > { %s1712_s13 = scalar_lea.hbm %s1954_s8, 128  ;;  %p1714_p0 = pneg %p1956_p11 }
  0x36   : > { %p1713_p13 = scmp.ne.s32.totalorder %s1954_s8, %s1712_s13  ;;  %s1717_s17 = scalar_lea.hbm %s2119_s0, 256 }
  0x37   : > { %p1718_p1 = scmp.lt.s32.totalorder %s1954_s8, %s2119_s0  ;;  %p1719_p2 = scmp.lt.s32.totalorder %s1717_s17, %s1712_s13 }
  0x38   : > { %p1715_p5 = pnand %p1714_p0, %p1713_p13 }
  0x39   : > { %p1720_p6 = por %p1719_p2, %p1718_p1 }
  0x3a   : > { %p1716_p10 = pneg %p1715_p5 }
  0x3c   : > { %p1721_p12 = pnand %p1720_p6, %p1716_p10 }
  0x3e   : > { %1724 = shalt.err (!%p1721_p12)
}
  0x3f   : > { %s1725_s6 = scalar_lea.vmem %s220_s10, 128  ;;  %s1814_s28 = smov [#allocation2]  }
  0x40   : > { %p1726_p7 = scmp.ne.s32.totalorder %s220_s10, %s1725_s6  ;;  %s1730_s7 = sshll.u32 %s1814_s28, 4  ;;  %s1731_s7 = int_to_ptr.vmem [resolvable:$false] %s1730_s7 }
  0x41   : > { %s1732_s9 = scalar_lea.vmem %s1731_s7, 256  ;;  %p1733_p13 = scmp.lt.s32.totalorder %s220_s10, %s1731_s7 }
  0x42   : > { %p1728_p9 = pnand %p1726_p7, %p1714_p0  ;;  %p1734_p5 = scmp.lt.s32.totalorder %s1732_s9, %s1725_s6 }
  0x44   : > { %p1729_p3 = pneg %p1728_p9  ;;  %p1735_p4 = por %p1734_p5, %p1733_p13 }
  0x46   : > { %p1736_p8 = pnand %p1735_p4, %p1729_p3 }
  0x48   : > { %1739 = shalt.err (!%p1736_p8)
}
  0x49   : > { %1584 = dma.hbm_to_vmem [thread:$0]  (!%p1956_p11), %s1954_s8, 128, %s220_s10, %s209_s12  }
  0x4a   : > { %p2136_p10 = scmp.ne.s32.totalorder %s2131_s26, 0 }
  0x4b   : > { %s1977_s13 = sand.u32 (!%p2136_p10), 1, %s1800_s19   ;;  %p2137_p4 = scmp.ne.s32.totalorder (!%p2136_p10), %s2129_s24, 0 }
  0x4c   : > { %228 = sbr.rel (%p2136_p10) target bundleno = 2531 (0x9e3), region = 40  ;;  %s1435_s14 = sshll.u32 (!%p2136_p10), %s1977_s13, 3 }
  0x4d   : > { %s231_s16 = scalar_lea.sflag (!%p2136_p10), [#allocation3], %s1977_s13  ;;  %s234_s17 = scalar_lea.vmem (!%p2136_p10), [#allocation2], %s1435_s14 }
  0x51   : > { %1783 = dma.done.wait (%p2137_p4), %s231_s16, 128  }
  0x52   : > { %1785 = vsyncadd (%p2137_p4), %s231_s16, 4294967168  ;;  %p2138_p8 = scmp.eq.s32.totalorder %s1880_s22, 0 }
  0x54   : > { %1787 = dma.done.wait (%p2138_p8), [#allocation6], 1024   ;;  %p2139_p3 = pmov %p2138_p8 }
  0x55   : > { %v1815_v0 = vmov 0.0   ;;  %vm1816_vm0 = vmmov 0   ;;  %v273_v1 = vld [vmem:[#allocation5 + $0x18] sm:$0xff]  ;;  %v272_v2 = vld [vmem:[#allocation5 + $0x10] sm:$0xff]  ;;  %v271_v3 = vld [vmem:[#allocation5 + $0x8] sm:$0xff]  ;;  %vm281_vm1 = vcmask 261120  }
  0x56   : > { %1789 = vsyncadd (%p2139_p3), [#allocation6], 4294966272  ;;  %1491 = vmatprep.subr.mxu0 %v1815_v0  ;;  %1499 = vmatprep.mubr.msk.f32.mxu0 %vm1816_vm0, %v1815_v0  ;;  %v270_v4 = vld [vmem:[#allocation5] sm:$0xff]  ;;  %v269_v5 = vld [vmem:[%s234_s17] sm:$0xff]  ;;  %s1817_s8 = smov 96   ;;  %s1818_s10 = smov 120  }
  0x57   : > { %1502 = vmatprep.subr.mxu1 %v1815_v0  ;;  %1504 = vmatprep.mubr.msk.f32.mxu1 %vm1816_vm0, %v1815_v0  ;;  %v1439_v6 = vld [vmem:[%s2121_s2] ss:$0 sm:$0xff]  ;;  %s1819_s11 = smov 88   ;;  %vm359_vm2 = vcmask 64512   ;;  %s1820_s12 = smov 56   ;;  %v522_v38 = vld [vmem:[#allocation7] sm:$0xff] }
  0x58   : > { %1492 = vmatpush3.msra.mxu0 %v273_v1  ;;  %s1821_s30 = smov 64   ;;  %s1822_s29 = smov 80   ;;  %v688_v39 = vld [vmem:[#allocation7 + $0x8] sm:$0xff] }
  0x59   : > { %1493 = vmatprep.subr.mxu0 %v1815_v0  ;;  %s1823_s6 = smov 112   ;;  %s1824_s28 = smov 72  }
  0x5a   : > { %1494 = vmatpush3.msra.mxu0 %v272_v2  ;;  %s1825_s7 = smov 104   ;;  %s1826_s9 = smov 48   ;;  %v1000_v2 = vld [vmem:[#allocation7 + $0x10] sm:$0xff] }
  0x5b   : > { %1495 = vmatprep.subr.mxu0 %v1815_v0  ;;  %s1827_s16 = smov 40   ;;  %s1459_s26 = sshll.u32 %s1880_s22, 7 }
  0x5c   : > { %1496 = vmatpush3.msra.mxu0 %v271_v3  ;;  %p2140_p0 = scmp.ne.s32.totalorder %s2134_s23, 0  ;;  %s1828_s22 = smov [#allocation8]  }
  0x5d   : > { %1497 = vmatprep.subr.mxu0 %v1815_v0 }
  0x5e   : > { %1498 = vmatpush3.msra.mxu0 %v270_v4 }
  0x5f   : > { %1500 = vmatmul.mubr.msk.f32.vlgmr.msra.gmra.mxu0 %vm281_vm1, %v269_v5  ;;  %1512 = vmatprep.subr.mxu0 %v1815_v0 }
  0x60   : > { %1514 = vmatprep.mubr.msk.f32.mxu0 %vm1816_vm0, %v1815_v0 }
 0x11f   : > { %v351_v7 = vpop.f32.mrf.mxu0 }
 0x120   : > { %v2007_v8 = vadd.f32 %v1439_v6, %v351_v7 }
 0x121   : > { %v1501_v9 = vpop.f32.mrf.mxu0 }
 0x122   : > { %357 = vrot.lane.b32.xlu0 %v2007_v8, %s1817_s8  ;;  %v2011_v10 = vmul.f32 0.35355338, %v2007_v8  ;;  %s268_s8 = scalar_lea.vmem [#allocation8], %s1435_s14 }
 0x124   : > { %523 = vrot.lane.b32.xlu1 %v2011_v10, %s1818_s10  ;;  %s1338_s10 = sshll.u32 %s268_s8, 4  ;;  %s1339_s10 = int_to_ptr.vmem [resolvable:$true] %s1338_s10 }
 0x126   : > { %525 = vrot.lane.b32.xlu0 %v2007_v8, %s1819_s11 }
 0x194   : > { %v358_v11 = vpop.permute.xlu0 %357 }
 0x195   : > { %1503 = vmatpush3.xpose.msk.msra.mxu1 %vm359_vm2, %v358_v11 }
 0x196   : > { %1507 = vmatprep.subr.mxu1 %v1815_v0  ;;  %v524_v13 = vpop.permute.xlu1 %523 }
 0x198   : > { %v526_v12 = vpop.permute.xlu0 %525  ;;  %1505 = vmatmul.mubr.msk.f32.vlgmr.msra.gmra.mxu1 %vm359_vm2, %v2011_v10 }
 0x199   : > { %1513 = vmatpush3.xpose.msk.msra.mxu0 %vm359_vm2, %v526_v12  ;;  %1509 = vmatprep.mubr.msk.f32.mxu1 %vm1816_vm0, %v1815_v0 }
 0x19a   : > { %1522 = vmatprep.subr.mxu0 %v1815_v0 }
 0x19c   : > { %1515 = vmatmul.mubr.msk.f32.vlgmr.msra.gmra.mxu0 %vm359_vm2, %v524_v13 }
 0x19d   : > { %1524 = vmatprep.mubr.msk.f32.mxu0 %vm1816_vm0, %v1815_v0  ;;  %1523 = vmatpush3.msra.mxu0 %v688_v39 }
 0x19e   : > { %1532 = vmatprep.subr.mxu0 %v1815_v0 }
 0x258   : > { %v431_v14 = vpop.f32.mrf.mxu1 }
 0x259   : > { %v435_v15 = vsel %vm359_vm2, %v431_v14, -inf }
 0x25a   : > { %436 = vmax.xlane.f32.xlu1 %v435_v15  ;;  %v1506_v16 = vpop.f32.mrf.mxu1 }
 0x25c   : > { %v597_v17 = vpop.f32.mrf.mxu0 }
 0x25d   : > { %v601_v18 = vsel %vm359_vm2, %v597_v17, -inf }
 0x25e   : > { %602 = vmax.xlane.f32.xlu0 %v601_v18  ;;  %v1516_v19 = vpop.f32.mrf.mxu0 }
 0x2e3   : > { %v437_v20 = vpop.xlane.xlu1 %436 }
 0x2e4   : > { %v438_v21 = vsub.f32 %v431_v14, %v437_v20 }
 0x2e6   : > { %v439_v22 = vmul.f32 1.442695, %v438_v21 }
 0x2e7   : > { %v603_v23 = vpop.xlane.xlu0 %602 }
 0x2e8   : > { %1644 = vpow2.f32 %v439_v22  ;;  %v604_v24 = vsub.f32 %v597_v17, %v603_v23  ;;  %v1457_v23 = vld [vmem:[%s2123_s4] ss:$0 sm:$0xff] }
 0x2ea   : > { %v605_v25 = vmul.f32 1.442695, %v604_v24 }
 0x2ec   : > { %1646 = vpow2.f32 %v605_v25 }
 0x2f5   : > { %v1645_v26 = vpop.eup %1644 }
 0x2f6   : > { %v441_v27 = vsel %vm359_vm2, %v1645_v26, 0.0 }
 0x2f7   : > { %442 = vadd.xlane.f32.xlu0 %v441_v27 }
 0x2f9   : > { %v1647_v28 = vpop.eup %1646 }
 0x2fa   : > { %v607_v29 = vsel %vm359_vm2, %v1647_v28, 0.0 }
 0x2fb   : > { %608 = vadd.xlane.f32.xlu1 %v607_v29 }
 0x30c   : > { %612 = vrot.lane.b32.xlu1 %v2007_v8, %s1820_s12 }
 0x30d   : > { %446 = vrot.lane.b32.xlu0 %v2007_v8, %s1821_s30  ;;  %s1336_s30 = scalar_lea.hbm %s2124_s5, %s1459_s26 }
 0x310   : > { %837 = vrot.lane.b32.xlu1 %v2007_v8, %s1822_s29  ;;  %s1325_s29 = scalar_lea.sflag [#allocation4], %s1977_s13 }
 0x311   : > { %835 = vrot.lane.b32.xlu0 %v2011_v10, %s1823_s6  ;;  %s1740_s6 = scalar_lea.vmem %s1339_s10, 128 }
 0x312   : > { %p1741_p11 = scmp.ne.s32.totalorder %s1339_s10, %s1740_s6 }
 0x314   : > { %p1742_p1 = pnand %p1741_p11, %p2140_p0 }
 0x316   : > { %p1743_p2 = pneg %p1742_p1 }
 0x380   : > { %v443_v30 = vpop.xlane.xlu0 %442 }
 0x381   : > { %1648 = vrcp.f32 %v443_v30 }
 0x384   : > { %v609_v31 = vpop.xlane.xlu1 %608  ;;  %v447_v32 = vpop.permute.xlu0 %446 }
 0x385   : > { %1650 = vrcp.f32 %v609_v31  ;;  %1508 = vmatpush3.msra.mxu1 %v447_v32 }
 0x386   : > { %1517 = vmatprep.subr.mxu1 %v1815_v0 }
 0x388   : > { %v613_v35 = vpop.permute.xlu1 %612  ;;  %v836_v45 = vpop.permute.xlu0 %835 }
 0x38c   : > { %v838_v43 = vpop.permute.xlu1 %837 }
 0x38e   : > { %v1649_v33 = vpop.eup %1648 }
 0x38f   : > { %v445_v34 = vmul.f32 %v1649_v33, %v1645_v26 }
 0x391   : > { %1510 = vmatmul.mubr.msk.f32.vlgmr.msra.gmra.mxu1 %vm359_vm2, %v445_v34 }
 0x392   : > { %v1651_v36 = vpop.eup %1650  ;;  %1518 = vmatpush3.msra.mxu1 %v613_v35  ;;  %1519 = vmatprep.mubr.msk.f32.mxu1 %vm1816_vm0, %v1815_v0 }
 0x393   : > { %v611_v37 = vmul.f32 %v1651_v36, %v1647_v28  ;;  %1527 = vmatprep.subr.mxu1 %v1815_v0 }
 0x395   : > { %1520 = vmatmul.mubr.msk.f32.vlgmr.msra.gmra.mxu1 %vm359_vm2, %v611_v37 }
 0x396   : > { %1529 = vmatprep.mubr.msk.f32.mxu1 %vm1816_vm0, %v1815_v0  ;;  %1528 = vmatpush3.msra.mxu1 %v522_v38 }
 0x397   : > { %1537 = vmatprep.subr.mxu1 %v1815_v0 }
 0x451   : > { %v518_v40 = vpop.f32.mrf.mxu1 }
 0x452   : > { %1530 = vmatmul.mubr.msk.f32.vlgmr.msra.gmra.mxu1 %vm359_vm2, %v518_v40 }
 0x453   : > { %v1511_v41 = vpop.f32.mrf.mxu1  ;;  %1539 = vmatprep.mubr.msk.f32.mxu1 %vm1816_vm0, %v1815_v0 }
 0x455   : > { %v684_v42 = vpop.f32.mrf.mxu1 }
 0x456   : > { %1525 = vmatmul.mubr.msk.f32.vlgmr.msra.gmra.mxu0 %vm359_vm2, %v684_v42 }
 0x457   : > { %1533 = vmatpush3.xpose.msk.msra.mxu0 %vm359_vm2, %v838_v43  ;;  %v1521_v44 = vpop.f32.mrf.mxu1  ;;  %1534 = vmatprep.mubr.msk.f32.mxu0 %vm1816_vm0, %v1815_v0 }
 0x458   : > { %1542 = vmatprep.subr.mxu0 %v1815_v0 }
 0x45a   : > { %1535 = vmatmul.mubr.msk.f32.vlgmr.msra.gmra.mxu0 %vm359_vm2, %v836_v45 }
 0x45b   : > { %1544 = vmatprep.mubr.msk.f32.mxu0 %vm1816_vm0, %v1815_v0  ;;  %1543 = vmatpush3.msra.mxu0 %v1000_v2 }
 0x45c   : > { %1552 = vmatprep.subr.mxu0 %v1815_v0 }
 0x512   : > { %v831_v46 = vpop.f32.mrf.mxu1 }
 0x514   : > { %v1531_v47 = vpop.f32.mrf.mxu1 }
 0x516   : > { %v758_v48 = vpop.f32.mrf.mxu0 }
 0x517   : > { %v832_v49 = vadd.f32 %v831_v46, %v758_v48 }
 0x518   : > { %v1526_v50 = vpop.f32.mrf.mxu0 }
 0x51a   : > { %v909_v51 = vpop.f32.mrf.mxu0 }
 0x51b   : > { %v913_v52 = vsel %vm359_vm2, %v909_v51, -inf }
 0x51c   : > { %914 = vmax.xlane.f32.xlu1 %v913_v52  ;;  %v1536_v53 = vpop.f32.mrf.mxu0 }
 0x52d   : > { %1077 = vrot.lane.b32.xlu1 %v2007_v8, %s1824_s28  ;;  %s1744_s28 = sshll.u32 %s1828_s22, 4  ;;  %s1745_s28 = int_to_ptr.vmem [resolvable:$false] %s1744_s28 }
 0x52e   : > { %s1746_s14 = scalar_lea.vmem %s1745_s28, 256  ;;  %p1747_p6 = scmp.lt.s32.totalorder %s1339_s10, %s1745_s28 }
 0x52f   : > { %p1748_p12 = scmp.lt.s32.totalorder %s1746_s14, %s1740_s6 }
 0x531   : > { %1075 = vrot.lane.b32.xlu1 %v2011_v10, %s1825_s7  ;;  %p1749_p7 = por %p1748_p12, %p1747_p6 }
 0x533   : > { %p1750_p9 = pnand %p1749_p7, %p1743_p2 }
 0x5a5   : > { %v915_v54 = vpop.xlane.xlu1 %914 }
 0x5a6   : > { %v916_v55 = vsub.f32 %v909_v51, %v915_v54 }
 0x5a8   : > { %v917_v56 = vmul.f32 1.442695, %v916_v55 }
 0x5a9   : > { %v1078_v62 = vpop.permute.xlu1 %1077 }
 0x5aa   : > { %1652 = vpow2.f32 %v917_v56 }
 0x5ad   : > { %v1076_v1 = vpop.permute.xlu1 %1075 }
 0x5b7   : > { %v1653_v57 = vpop.eup %1652 }
 0x5b8   : > { %v919_v58 = vsel %vm359_vm2, %v1653_v57, 0.0 }
 0x5b9   : > { %920 = vadd.xlane.f32.xlu0 %v919_v58 }
 0x5cf   : > { %924 = vrot.lane.b32.xlu0 %v2007_v8, %s1826_s9 }
 0x642   : > { %v921_v59 = vpop.xlane.xlu0 %920 }
 0x643   : > { %1654 = vrcp.f32 %v921_v59 }
 0x646   : > { %v925_v60 = vpop.permute.xlu0 %924 }
 0x647   : > { %1538 = vmatpush3.msra.mxu1 %v925_v60 }
 0x648   : > { %1547 = vmatprep.subr.mxu1 %v1815_v0 }
 0x650   : > { %v1655_v61 = vpop.eup %1654 }
 0x651   : > { %v923_v63 = vmul.f32 %v1655_v61, %v1653_v57 }
 0x653   : > { %1540 = vmatmul.mubr.msk.f32.vlgmr.msra.gmra.mxu1 %vm359_vm2, %v923_v63 }
 0x654   : > { %1548 = vmatpush3.xpose.msk.msra.mxu1 %vm359_vm2, %v1078_v62  ;;  %1549 = vmatprep.mubr.msk.f32.mxu1 %vm1816_vm0, %v1815_v0 }
 0x655   : > { %1557 = vmatprep.subr.mxu1 %v1815_v0 }
 0x657   : > { %1550 = vmatmul.mubr.msk.f32.vlgmr.msra.gmra.mxu1 %vm359_vm2, %v1076_v1 }
 0x658   : > { %1559 = vmatprep.mubr.msk.f32.mxu1 %vm1816_vm0, %v1815_v0 }
 0x713   : > { %v996_v3 = vpop.f32.mrf.mxu1 }
 0x714   : > { %1545 = vmatmul.mubr.msk.f32.vlgmr.msra.gmra.mxu0 %vm359_vm2, %v996_v3 }
 0x715   : > { %v1541_v4 = vpop.f32.mrf.mxu1  ;;  %1554 = vmatprep.mubr.msk.f32.mxu0 %vm1816_vm0, %v1815_v0  ;;  %v1240_v0 = vld [vmem:[#allocation7 + $0x18] sm:$0xff] }
 0x716   : > { %1558 = vmatpush3.msra.mxu1 %v1240_v0 }
 0x717   : > { %v1149_v5 = vpop.f32.mrf.mxu1 }
 0x718   : > { %v1153_v6 = vsel %vm359_vm2, %v1149_v5, -inf }
 0x719   : > { %1154 = vmax.xlane.f32.xlu0 %v1153_v6  ;;  %v1551_v7 = vpop.f32.mrf.mxu1 }
 0x72f   : > { %1164 = vrot.lane.b32.xlu0 %v2007_v8, %s1827_s16 }
 0x7a2   : > { %v1155_v9 = vpop.xlane.xlu0 %1154 }
 0x7a3   : > { %v1156_v10 = vsub.f32 %v1149_v5, %v1155_v9 }
 0x7a5   : > { %v1157_v11 = vmul.f32 1.442695, %v1156_v10 }
 0x7a6   : > { %v1165_v12 = vpop.permute.xlu0 %1164 }
 0x7a7   : > { %1656 = vpow2.f32 %v1157_v11  ;;  %1553 = vmatpush3.msra.mxu0 %v1165_v12 }
 0x7b4   : > { %v1657_v13 = vpop.eup %1656 }
 0x7b5   : > { %v1159_v14 = vsel %vm359_vm2, %v1657_v13, 0.0 }
 0x7b6   : > { %1160 = vadd.xlane.f32.xlu1 %v1159_v14 }
 0x7d4   : > { %v1070_v15 = vpop.f32.mrf.mxu0 }
 0x7d5   : > { %v1074_v16 = vadd.f32 %v1070_v15, %v832_v49 }
 0x7d6   : > { %v1546_v17 = vpop.f32.mrf.mxu0 }
 0x83f   : > { %v1161_v18 = vpop.xlane.xlu1 %1160 }
 0x840   : > { %1658 = vrcp.f32 %v1161_v18 }
 0x84d   : > { %v1659_v8 = vpop.eup %1658 }
 0x84e   : > { %v1163_v19 = vmul.f32 %v1659_v8, %v1657_v13 }
 0x850   : > { %1555 = vmatmul.mubr.msk.f32.vlgmr.msra.gmra.mxu0 %vm359_vm2, %v1163_v19 }
 0x910   : > { %v1236_v20 = vpop.f32.mrf.mxu0 }
 0x911   : > { %1560 = vmatmul.mubr.msk.f32.vlgmr.msra.gmra.mxu1 %vm359_vm2, %v1236_v20 }
 0x912   : > { %v1556_v21 = vpop.f32.mrf.mxu0 }
 0x9d1   : > { %v1310_v22 = vpop.f32.mrf.mxu1 }
 0x9d2   : > { %v1314_v24 = vadd.f32 %v1310_v22, %v1074_v16 }
 0x9d3   : > { %v1561_v25 = vpop.f32.mrf.mxu1 }
 0x9d4   : > { %v1322_v26 = vadd.f32 %v1457_v23, %v1314_v24 }
 0x9d6   : > { %1323 = vst.msk [vmem:[%s268_s8] sm:$0xff] %vm281_vm1, %v1322_v26 }
 0x9d7   : > { %1753 = shalt.err (!%p1750_p9)
}
 0x9d8   : > { %s1754_s7 = scalar_lea.hbm %s1336_s30, 128  ;;  %s1758_s16 = scalar_lea.hbm %s2124_s5, 256 }
 0x9d9   : > { %p1755_p13 = scmp.ne.s32.totalorder %s1336_s30, %s1754_s7  ;;  %p1759_p4 = scmp.lt.s32.totalorder %s1336_s30, %s2124_s5 }
 0x9da   : > { %p1760_p8 = scmp.lt.s32.totalorder %s1758_s16, %s1754_s7 }
 0x9db   : > { %p1756_p5 = pnand %p1755_p13, %p2140_p0 }
 0x9dc   : > { %p1761_p3 = por %p1760_p8, %p1759_p4 }
 0x9dd   : > { %p1757_p10 = pneg %p1756_p5 }
 0x9df   : > { %p1762_p11 = pnand %p1761_p3, %p1757_p10 }
 0x9e1   : > { %1765 = shalt.err (!%p1762_p11)
}
 0x9e2   : > { %1572 = dma.vmem_to_hbm [thread:$0]  (%p2140_p0), %s1339_s10, 128, %s1336_s30, %s1325_s29  }
 0x9e3 PF: > { %s1350_s26 = sand.u32 1, %s1796_s18   ;;  %p2141_p1 = scmp.ne.s32.totalorder %s2130_s25, 0 }
 0x9e4   : > { %p2142_p2 = scmp.ge.s32.totalorder %s1808_s21, 2  ;;  %s1351_s8 = scalar_lea.sflag [#allocation4], %s1350_s26 }
 0x9e6   : > { %p1586_p6 = pnand %p2142_p2, %p2141_p1 }
 0x9e8   : > { %p1587_p12 = pneg %p1586_p6 }
 0x9ea   : > { %1791 = dma.done.wait (%p1587_p12), %s1351_s8, 128  }
 0x9eb   : > { %1793 = vsyncadd (%p1587_p12), %s1351_s8, 4294967168  ;;  %p19_p7 = scmp.ge.s32.totalorder %s1931_s15, 4   ;;  %s2143_s18 = smov %s1800_s19 }
 0x9ec   : > { %s2144_s19 = smov %s1804_s20  ;;  %s2145_s20 = smov %s1947_s27 }
 0x9ed   : > { %s2146_s21 = smov %s1931_s15  ;;  %21 = sbr.rel (!%p19_p7) target bundleno = 6 (0x6), region = 93 }
 0x9f2   :  { %1356 = vsyncpa [#allocation3], 1 }
 0x9f3   :  { %1358 = vsyncpa [#allocation3 + $0x1], 1 }
 0x9f4   :  { %1359 = vsyncpa [#allocation6], 1 }
 0x9f5   :  { %1360 = vsyncpa [#allocation4], 1 }
 0x9f6   :  { %1362 = vsyncpa [#allocation4 + $0x1], 1 }

</bundles_post_ra>
